<compile_context>
chip_gen: v7x
topology: tpu7x:2x2x1
jax: 0.10.0
libtpu: 0.0.40
codegen_flags: <defaults>
</compile_context>

<pallas_src>
import functools

import jax
import jax.numpy as jnp
from jax import lax
from jax.experimental import pallas as pl
from jax.experimental.pallas import tpu as pltpu


def _dice_partials_kernel(x_ref, y_ref, out_ref, *, total_m, tile_m, needs_mask):
    """Grid = (batch n [parallel], voxel-tile i [arbitrary, reduction]).

    x_ref  : (1, C, TM)  predictions (bf16/f32) for batch n, voxel tile i
    y_ref  : (1, 1, TM)  integer labels for batch n, voxel tile i
    out_ref: (1, C, 3)   f32 running [intersection, sum_x, sum_y] per class,
                         resident across the reduction axis (accumulator).
    """
    i = pl.program_id(1)

    # --- init accumulator on the first voxel tile of this batch element -----
    @pl.when(i == 0)
    def _():
        out_ref[...] = jnp.zeros_like(out_ref)

    x = x_ref[0].astype(jnp.float32)           # (C, TM) upcast in-register
    y = y_ref[0].astype(jnp.int32)             # (1, TM)

    # one-hot(y) built in-register: class index per sublane row
    classes = lax.broadcasted_iota(jnp.int32, x.shape, 0)      # (C, TM)
    onehot_b = y == classes                                    # (C, TM) bool

    if needs_mask:
        # Last tile may run past the true voxel count; zero out garbage lanes.
        valid = total_m - i * tile_m
        lane = lax.broadcasted_iota(jnp.int32, x.shape, 1)
        keep = lane < valid
        x = jnp.where(keep, x, 0.0)
        onehot_b = jnp.logical_and(onehot_b, keep)

    onehot = onehot_b.astype(jnp.float32)                      # (C, TM)

    inter = jnp.sum(x * onehot, axis=1, keepdims=True)         # (C, 1)
    sx = jnp.sum(x, axis=1, keepdims=True)                     # (C, 1)
    sy = jnp.sum(onehot, axis=1, keepdims=True)                # (C, 1)

    # Tiny per-tile accumulate into the resident (1, C, 3) output block.
    out_ref[...] += jnp.concatenate([inter, sx, sy], axis=1)[None]


@functools.partial(jax.jit, static_argnames=("max_tile_m",))
def dice_loss_pallas(x, y, weights, max_tile_m=32768):
    """x: (N, C, D, H, W) float (f32/bf16), y: (N, D, H, W) integer labels,
    weights: (C,) float.  Returns shape-(1,) float32 loss (matches torch)."""
    N, C, D, H, W = x.shape
    M = D * H * W

    # Free, contiguous reshapes -- no transpose, no pad, no dtype copy in HBM.
    x3 = x.reshape(N, C, M)
    if not jnp.issubdtype(y.dtype, jnp.integer):
        y = y.astype(jnp.int32)
    y3 = y.reshape(N, 1, M)

    if M <= max_tile_m:
        tile_m = M                      # full-dim lane block is always legal
    else:
        tile_m = max_tile_m             # multiple of 128
    num_tiles = pl.cdiv(M, tile_m)
    needs_mask = (M % tile_m) != 0

    kernel = functools.partial(
        _dice_partials_kernel, total_m=M, tile_m=tile_m, needs_mask=needs_mask)

    partials = pl.pallas_call(
        kernel,
        out_shape=jax.ShapeDtypeStruct((N, C, 3), jnp.float32),
        grid_spec=pltpu.PrefetchScalarGridSpec(
            num_scalar_prefetch=0,
            grid=(N, num_tiles),
            in_specs=[
                pl.BlockSpec((1, C, tile_m), lambda n, i: (n, 0, i)),   # x tile
                pl.BlockSpec((1, 1, tile_m), lambda n, i: (n, 0, i)),   # y tile
            ],
            out_specs=pl.BlockSpec((1, C, 3), lambda n, i: (n, 0, 0)),
        ),
        compiler_params=pltpu.CompilerParams(
            # batch axis parallel (uses both TCs on v7x), voxel axis = reduction
            dimension_semantics=("parallel", "arbitrary"),
        ),
    )(x3, y3)

    # Tiny final combine in plain JAX (negligible flops).
    totals = jnp.sum(partials, axis=0)          # (C, 3)
    inter, sx, sy = totals[:, 0], totals[:, 1], totals[:, 2]
    eps = jnp.float32(1.0)                      # module's epsilon
    w = weights.astype(jnp.float32)
    loss = -jnp.sum((2.0 * (inter + eps)) / (sx + sy + eps) * w) / jnp.sum(w)
    return loss.reshape(1)                      # torch returns a shape-(1,) tensor


def dice_loss_ref(x, y, weights):
    """Pure-JAX reference mirroring the PyTorch forward."""
    C = x.shape[1]
    xf = x.astype(jnp.float32)
    y_one_hot = jax.nn.one_hot(y.astype(jnp.int32), C, axis=1, dtype=jnp.float32)
    eps = 1.0
    loss = 0.0
    for i in range(C):
        x_i = xf[:, i]
        y_i = y_one_hot[:, i]
        inter = jnp.sum(x_i * y_i) + eps
        union = jnp.sum(x_i) + jnp.sum(y_i) + eps
        loss = loss - (2.0 * inter / union) * weights[i].astype(jnp.float32)
    return (loss / jnp.sum(weights)).reshape(1)


if __name__ == "__main__":
    # Deterministic "parameters" from the module's __init__.
    weights = jnp.array([0.1, 1.0, 1.0, 0.0, 1.0], dtype=jnp.float32)

    # Small 5-D input consistent with the forward: x (N, C, D, H, W), y (N, D, H, W)
    key = jax.random.PRNGKey(0)
    kx, ky = jax.random.split(key)
    N, C, D, H, W = 2, 5, 4, 8, 8
    x = jax.random.uniform(kx, (N, C, D, H, W), dtype=jnp.float32).astype(jnp.bfloat16)
    y = jax.random.randint(ky, (N, D, H, W), 0, C, dtype=jnp.int32).astype(jnp.int8)

    loss = jax.block_until_ready(dice_loss_pallas(x, y, weights))
    ref = jax.block_until_ready(dice_loss_ref(x, y, weights))

    assert jnp.allclose(loss, ref, rtol=1e-5, atol=1e-5), (loss, ref)
    print("KERNEL_OK")
</pallas_src>

<mosaic_0001>
module attributes {stable_mosaic.version = 11 : i64} {
  func.func @_dice_partials_kernel(%arg0: i32, %arg1: i32, %arg2: memref<1x5x256xbf16, #tpu.memory_space<vmem>>, %arg3: memref<1x1x256xi8, #tpu.memory_space<vmem>>, %arg4: memref<1x5x3xf32, #tpu.memory_space<vmem>>) attributes {dimension_semantics = [#tpu.dimension_semantics<parallel>, #tpu.dimension_semantics<arbitrary>], iteration_bounds = array<i64: 2, 1>, scalar_prefetch = 0 : i64, scratch_operands = 0 : i64, tpu.core_type = #tpu.core_type<tc>, window_params = [{transform_indices = @transform_0, window_bounds = array<i64: 1, 5, 256>}, {transform_indices = @transform_1, window_bounds = array<i64: 1, 1, 256>}, {transform_indices = @transform_2, window_bounds = array<i64: 1, 5, 3>}]} {
    %c0_i32 = arith.constant 0 : i32
    %0 = arith.cmpi eq, %arg1, %c0_i32 : i32
    %1 = arith.extui %0 : i1 to i32
    %c0_i32_0 = arith.constant 0 : i32
    %2 = arith.cmpi ne, %1, %c0_i32_0 : i32
    scf.if %2 {
      %cst_14 = arith.constant 0.000000e+00 : f32
      %26 = vector.broadcast %cst_14 : f32 to vector<1x5x3xf32>
      %c0_15 = arith.constant 0 : index
      %c0_16 = arith.constant 0 : index
      %c0_17 = arith.constant 0 : index
      %27 = vector.load %arg4[%c0_15, %c0_16, %c0_17] : memref<1x5x3xf32, #tpu.memory_space<vmem>>, vector<1x5x3xf32>
      tpu.vector_store %arg4[%c0_15, %c0_16, %c0_17], %26 {strides = array<i32>} : memref<1x5x3xf32, #tpu.memory_space<vmem>>, vector<1x5x3xf32>,
    } else {
    }
    %c0 = arith.constant 0 : index
    %c0_1 = arith.constant 0 : index
    %c0_2 = arith.constant 0 : index
    %3 = vector.load %arg2[%c0, %c0_1, %c0_2] : memref<1x5x256xbf16, #tpu.memory_space<vmem>>, vector<1x5x256xbf16>
    %4 = vector.shape_cast %3 : vector<1x5x256xbf16> to vector<5x256xbf16>
    %5 = arith.extf %4 : vector<5x256xbf16> to vector<5x256xf32>
    %c0_3 = arith.constant 0 : index
    %c0_4 = arith.constant 0 : index
    %c0_5 = arith.constant 0 : index
    %6 = vector.load %arg3[%c0_3, %c0_4, %c0_5] : memref<1x1x256xi8, #tpu.memory_space<vmem>>, vector<1x1x256xi8>
    %7 = vector.shape_cast %6 : vector<1x1x256xi8> to vector<1x256xi8>
    %8 = arith.extsi %7 : vector<1x256xi8> to vector<1x256xi32>
    %9 = tpu.iota {dimensions = array<i32: 0>} : vector<5x256xi32>
    %10 = vector.broadcast %8 : vector<1x256xi32> to vector<5x256xi32>
    %11 = arith.cmpi eq, %10, %9 : vector<5x256xi32>
    %12 = arith.extui %11 : vector<5x256xi1> to vector<5x256xi32>
    %13 = arith.sitofp %12 : vector<5x256xi32> to vector<5x256xf32>
    %14 = arith.mulf %5, %13 : vector<5x256xf32>
    %cst = arith.constant dense<0.000000e+00> : vector<5xf32>
    %15 = vector.multi_reduction <add>, %14, %cst [1] : vector<5x256xf32> to vector<5xf32>
    %16 = vector.shape_cast %15 : vector<5xf32> to vector<5x1xf32>
    %cst_6 = arith.constant dense<0.000000e+00> : vector<5xf32>
    %17 = vector.multi_reduction <add>, %5, %cst_6 [1] : vector<5x256xf32> to vector<5xf32>
    %18 = vector.shape_cast %17 : vector<5xf32> to vector<5x1xf32>
    %cst_7 = arith.constant dense<0.000000e+00> : vector<5xf32>
    %19 = vector.multi_reduction <add>, %13, %cst_7 [1] : vector<5x256xf32> to vector<5xf32>
    %20 = vector.shape_cast %19 : vector<5xf32> to vector<5x1xf32>
    %c0_8 = arith.constant 0 : index
    %c0_9 = arith.constant 0 : index
    %c0_10 = arith.constant 0 : index
    %21 = vector.load %arg4[%c0_8, %c0_9, %c0_10] : memref<1x5x3xf32, #tpu.memory_space<vmem>>, vector<1x5x3xf32>
    %22 = tpu.concatenate %16, %18, %20 in 1 : vector<5x1xf32>, vector<5x1xf32>, vector<5x1xf32> -> vector<5x3xf32>
    %23 = vector.shape_cast %22 : vector<5x3xf32> to vector<1x5x3xf32>
    %24 = arith.addf %21, %23 : vector<1x5x3xf32>
    %c0_11 = arith.constant 0 : index
    %c0_12 = arith.constant 0 : index
    %c0_13 = arith.constant 0 : index
    %25 = vector.load %arg4[%c0_11, %c0_12, %c0_13] : memref<1x5x3xf32, #tpu.memory_space<vmem>>, vector<1x5x3xf32>
    tpu.vector_store %arg4[%c0_11, %c0_12, %c0_13], %24 {strides = array<i32>} : memref<1x5x3xf32, #tpu.memory_space<vmem>>, vector<1x5x3xf32>,
    return
  }
  func.func @transform_0(%arg0: i32, %arg1: i32) -> (i32, i32, i32) {
    %c0_i32 = arith.constant 0 : i32
    %c0_i32_0 = arith.constant 0 : i32
    return %arg0, %c0_i32, %arg1 : i32, i32, i32
  }
  func.func @transform_1(%arg0: i32, %arg1: i32) -> (i32, i32, i32) {
    %c0_i32 = arith.constant 0 : i32
    %c0_i32_0 = arith.constant 0 : i32
    return %arg0, %c0_i32, %arg1 : i32, i32, i32
  }
  func.func @transform_2(%arg0: i32, %arg1: i32) -> (i32, i32, i32) {
    %c0_i32 = arith.constant 0 : i32
    %c0_i32_0 = arith.constant 0 : i32
    %c0_i32_1 = arith.constant 0 : i32
    return %arg0, %c0_i32, %c0_i32_0 : i32, i32, i32
  }
}

</mosaic_0001>

<bundles_post_ra>
// kernel: dice_loss_pallas.1
= control target key start
LH: loop header
LB: loop body
LE: loop exit
PB: predicated region body
PF: predicated region fallthrough
CT: control target
= control target key end

     0   :  { %s425_s9 = smov 0   ;;  %s427_s10 = smov 0   ;;  %s469_s0 = inlined_call_operand.vmem [shape: bf16[2,5,256], index: 0, kind: input, shape index: {}]   ;;  %s470_s1 = inlined_call_operand.vmem [shape: s8[2,1,256], index: 1, kind: input, shape index: {}]   ;;  %s471_s2 = inlined_call_operand.vmem [shape: f32[2,5,3], index: 2, kind: output, shape index: {}]  }
   0x1   :  { %s429_s11 = smov 0  }
   0x2 LB: > { %s24_s12 = sadd.s32 1, %s403_s10  ;;  %p350_p0 = scmp.ge.s32.totalorder %s407_s11, 1  ;;  %s407_s11 = sphi %s429_s11, %s12_s11   ;;  %s403_s10 = sphi %s427_s10, %s473_s10   ;;  %s399_s9 = sphi %s425_s9, %s472_s9  }
   0x3   : > { %p26_p1 = scmp.ge.s32.totalorder %s24_s12, 2  ;;  %p147_p2 = scmp.lt.s32.totalorder %s407_s11, 3 }
   0x5   : > { %s475_s12 = smov (%p26_p1, %s24_s12), 0  ;;  %p148_p3 = pnand %p350_p0, %p147_p2 }
   0x6   : > { %p181_p4 = scmp.lt.s32.totalorder (!%p148_p3), %s399_s9, 1  ;;  %v214_v0 = vlaneseq (!%p148_p3)  ;;  %v409_v13 = vmov (!%p148_p3), 0.0   ;;  %vm240_vm2 = vcmask (!%p148_p3), 1044480   ;;  %vm207_vm3 = vcmask (!%p148_p3), 20480  }
   0x7   : > { %151 = sbr.rel (%p148_p3) target bundleno = 182 (0xb6), region = 28  ;;  %vm257_vm4 = vcmask (!%p148_p3), 7168   ;;  %vm259_vm5 = vcmask (!%p148_p3), 15360  }
   0x8   : > { %v215_v1 = vshrl.u32 (!%p148_p3), %v214_v0, 7 }
   0xa   : > { %v218_v2 = vsub.s32 (!%p148_p3), 0, %v215_v1  ;;  %v222_v3 = vsub.s32 (!%p148_p3), 4, %v215_v1 }
   0xe   : > { %s477_s9 = smov (!%p181_p4, %s399_s9), 1 }
   0xf   : > { %s359_s13 = sshll.u32 %s477_s9, 3  ;;  %s353_s14 = sshll.u32 %s477_s9, 1 }
  0x10   : > { %s188_s17 = scalar_lea.vmem %s469_s0, %s359_s13  ;;  %s197_s20 = scalar_lea.vmem %s470_s1, %s353_s14 }
  0x11   : > { %v212_v4 = vld [vmem:[%s197_s20] sm:$0x3]  ;;  %s202_s23 = scalar_lea.vmem %s471_s2, %s359_s13 }
  0x12   : > { %v213_v5 = vunpack.c.0.s8 %v212_v4  ;;  %v209_v6 = vld [vmem:[%s188_s17] sm:$0x77]  ;;  %208 = vst.msk [vmem:[%s202_s23] sm:$0x1f] %vm207_vm3, %v409_v13 }
  0x13   : > { %v210_v9 = vunpack.c.l.bf16 %v209_v6  ;;  %v211_v10 = vunpack.c.h.bf16 %v209_v6 }
  0x14   : > { %v219_v7 = vrot.slane %v213_v5, %v218_v2  ;;  %v223_v8 = vrot.slane %v213_v5, %v222_v3 }
  0x15   : > { %v246_v23 = vsel %vm240_vm2, %v210_v9, 0.0  ;;  %v247_v24 = vsel %vm240_vm2, %v211_v10, 0.0 }
  0x16   : > { %v227_v11 = vrot.slane %v219_v7, %v218_v2  ;;  %v231_v12 = vrot.slane %v223_v8, %v218_v2  ;;  %v248_v26 = vadd.f32 %v247_v24, %v246_v23 }
  0x18   : > { %vm232_vm0 = vcmp.eq.s32.totalorder %v227_v11, %v215_v1  ;;  %vm233_vm1 = vcmp.eq.s32.totalorder %v231_v12, %v215_v1 }
  0x19   : > { %v355_v14 = vsel %vm232_vm0, 1.0, %v409_v13  ;;  %v356_v15 = vsel %vm233_vm1, 1.0, %v409_v13  ;;  %v256_v30 = vld [vmem:[%s202_s23] sm:$0x1f] }
  0x1a   : > { %v238_v16 = vmul.f32 %v355_v14, %v210_v9  ;;  %v239_v17 = vmul.f32 %v356_v15, %v211_v10  ;;  %v251_v18 = vsel %vm240_vm2, %v355_v14, 0.0  ;;  %v252_v19 = vsel %vm240_vm2, %v356_v15, 0.0 }
  0x1b   : > { %v253_v20 = vadd.f32 %v252_v19, %v251_v18 }
  0x1c   : > { %v241_v21 = vsel %vm240_vm2, %v238_v16, 0.0  ;;  %v242_v22 = vsel %vm240_vm2, %v239_v17, 0.0 }
  0x1d   : > { %v243_v25 = vadd.f32 %v242_v22, %v241_v21  ;;  %254 = vadd.xlane.f32.xlu1 %v253_v20 }
  0x1f   : > { %244 = vadd.xlane.f32.xlu0 %v243_v25 }
  0x23   : > { %249 = vadd.xlane.f32.xlu0 %v248_v26 }
  0xaa   : > { %v255_v28 = vpop.xlane.xlu1 %254 }
  0xac   : > { %v245_v27 = vpop.xlane.xlu0 %244 }
  0xb0   : > { %v250_v29 = vpop.xlane.xlu0 %249 }
  0xb1   : > { %v258_v31 = vsel %vm257_vm4, %v245_v27, %v250_v29 }
  0xb2   : > { %v260_v32 = vsel %vm259_vm5, %v258_v31, %v255_v28 }
  0xb3   : > { %v261_v33 = vadd.f32 %v260_v32, %v256_v30 }
  0xb5   : > { %263 = vst.msk [vmem:[%s202_s23] sm:$0x1f] %vm207_vm3, %v261_v33 }
  0xb6 PF: > { %s12_s11 = sadd.s32 1, %s407_s11   ;;  %s472_s9 = smov %s403_s10 }
  0xb7   : > { %p9_p5 = scmp.ge.s32.totalorder %s12_s11, 4   ;;  %s473_s10 = smov %s475_s12 }
  0xb9   :  { %11 = sbr.rel (!%p9_p5) target bundleno = 2 (0x2), region = 65 }

</bundles_post_ra>
